<compile_context>
chip_gen: v7x
topology: tpu7x:2x2x1
jax: 0.10.0
libtpu: 0.0.40
codegen_flags: <defaults>
</compile_context>

<pallas_src>
import functools

import jax
import jax.numpy as jnp
from jax.experimental import pallas as pl
from jax.experimental.pallas import tpu as pltpu


def _round_up(n: int, m: int) -> int:
    return ((n + m - 1) // m) * m


def _policy_kernel(x_ref, w1_ref, b1_ref, w2_ref, b2_ref, wh_ref, bh_ref,
                   out_ref, *, action_size: int):
    """One batch tile: fc1+relu, fc2+relu, fused (action|value) head.

    out_ref[:, :action_size] = softmax(action logits)
    out_ref[:, action_size]  = state value
    """
    mxu_dtype = w1_ref.dtype
    x = x_ref[...]

    # fc1 + relu (low-precision operands into the MXU, f32 accumulate/VPU math)
    h1 = jnp.dot(x.astype(mxu_dtype), w1_ref[...],
                 preferred_element_type=jnp.float32) + b1_ref[...]
    h1 = jnp.maximum(h1, 0.0)

    # fc2 + relu
    h2 = jnp.dot(h1.astype(mxu_dtype), w2_ref[...],
                 preferred_element_type=jnp.float32) + b2_ref[...]
    h2 = jnp.maximum(h2, 0.0)

    # Fused head: one matmul yields action logits (cols < A) and the value
    # (col == A).  Padded columns (col > A) have zero weight and a -1e30 bias
    # folded in at prep time, so they drop out of the softmax automatically.
    head = jnp.dot(h2.astype(mxu_dtype), wh_ref[...],
                   preferred_element_type=jnp.float32) + bh_ref[...]

    p = head.shape[-1]
    col = jax.lax.broadcasted_iota(jnp.int32, (1, p), 1)   # (1, P), broadcasts
    is_value = col == action_size

    # Numerically-stable softmax over the action columns only.
    neg_big = jnp.float32(-1e30)
    masked = jnp.where(is_value, neg_big, head)            # pad cols already -1e30
    m = jnp.max(masked, axis=-1, keepdims=True)
    e = jnp.exp(masked - m)                                 # value/pad cols -> 0
    denom = jnp.sum(e, axis=-1, keepdims=True)
    inv = 1.0 / denom                                       # (tile_b, 1): cheap, exact
    probs = e * inv

    combined = jnp.where(is_value, head, probs)
    out_ref[...] = combined[:, :action_size + 1]


def _vmem_limit_bytes(tile_b, state_size, hidden, padded_head, w_dtype):
    f32 = 4
    wb = jnp.dtype(w_dtype).itemsize
    x_tile = tile_b * state_size * f32
    out_tile = tile_b * 128 * f32                     # lane-padded VMEM out buffer
    weights = ((state_size * hidden + hidden * hidden + hidden * padded_head) * wb
               + (2 * hidden + padded_head) * f32)
    interm = 6 * tile_b * max(hidden, padded_head) * f32
    # 2x: BlockSpec double-buffers operands; generous slack for compiler temps.
    needed = 2 * (x_tile + out_tile + weights) + interm + (8 << 20)
    return min(max(needed, 16 << 20), 64 << 20)


def prepare_params(params, mxu_dtype=jnp.bfloat16):
    """One-time param prep: fuse action+value heads, pad to 128 lanes, cast weights.

    Returns (prepared_dict, action_size).  Call once and cache; do not redo per step.
    """
    A = params["wa"].shape[1]
    P = 128 * pl.cdiv(A + 1, 128)
    wh = jnp.concatenate([params["wa"], params["wv"]], axis=1)
    wh = jnp.pad(wh, ((0, 0), (0, P - (A + 1))))
    bh = jnp.concatenate([params["ba"], params["bv"]], axis=1)
    # Fold the softmax pad-column sentinel into the head bias so the kernel
    # needs no extra masking for the padded columns.
    bh = jnp.pad(bh, ((0, 0), (0, P - (A + 1))), constant_values=-1e30)
    prepared = dict(
        w1=params["w1"].astype(mxu_dtype),
        b1=params["b1"].astype(jnp.float32),
        w2=params["w2"].astype(mxu_dtype),
        b2=params["b2"].astype(jnp.float32),
        wh=wh.astype(mxu_dtype),
        bh=bh.astype(jnp.float32),
    )
    return prepared, A


def policy_network_forward(x, prepared, action_size, *, tile_b: int = 2048):
    """x: (B, state_size) float32. Returns (action_probs (B, A), state_value (B,))."""
    B, S = x.shape
    H = prepared["w1"].shape[1]
    P = prepared["wh"].shape[1]
    A = action_size

    # Batch tiling: multiple of 8 sublanes; ensure >= 2 grid steps when the
    # batch allows it so v7x megacore can split the batch across TensorCores.
    tile_b = _round_up(max(tile_b, 8), 8)
    b8 = _round_up(B, 8)
    if b8 >= 16:
        tile_b = min(tile_b, _round_up(pl.cdiv(b8, 2), 8))
    else:
        tile_b = min(tile_b, b8)
    padded_b = _round_up(B, tile_b)
    if padded_b != B:
        x = jnp.pad(x, ((0, padded_b - B), (0, 0)))
    grid = (padded_b // tile_b,)

    vmem = pltpu.MemorySpace.VMEM
    resident = lambda i: (0, 0)        # weights/biases: same block every grid step

    out = pl.pallas_call(
        functools.partial(_policy_kernel, action_size=A),
        out_shape=jax.ShapeDtypeStruct((padded_b, A + 1), jnp.float32),
        grid_spec=pltpu.PrefetchScalarGridSpec(
            num_scalar_prefetch=0,
            grid=grid,
            in_specs=[
                pl.BlockSpec((tile_b, S), lambda i: (i, 0), memory_space=vmem),
                pl.BlockSpec((S, H), resident, memory_space=vmem),
                pl.BlockSpec((1, H), resident, memory_space=vmem),
                pl.BlockSpec((H, H), resident, memory_space=vmem),
                pl.BlockSpec((1, H), resident, memory_space=vmem),
                pl.BlockSpec((H, P), resident, memory_space=vmem),
                pl.BlockSpec((1, P), resident, memory_space=vmem),
            ],
            out_specs=pl.BlockSpec((tile_b, A + 1), lambda i: (i, 0),
                                   memory_space=vmem),
        ),
        compiler_params=pltpu.CompilerParams(
            dimension_semantics=("parallel",),
            vmem_limit_bytes=_vmem_limit_bytes(tile_b, S, H, P,
                                               prepared["w1"].dtype),
        ),
    )(x, prepared["w1"], prepared["b1"], prepared["w2"], prepared["b2"],
      prepared["wh"], prepared["bh"])

    action_probs = out[:B, :A]
    state_value = out[:B, A]
    return action_probs, state_value


def policy_network_reference(x, params):
    """Pure-JAX f32 reference matching the PyTorch module."""
    h1 = jnp.maximum(x @ params["w1"] + params["b1"], 0.0)
    h2 = jnp.maximum(h1 @ params["w2"] + params["b2"], 0.0)
    logits = h2 @ params["wa"] + params["ba"]
    probs = jax.nn.softmax(logits, axis=-1)
    value = (h2 @ params["wv"] + params["bv"])[:, 0]
    return probs, value


def init_params(key, state_size, action_size, hidden=128):
    """PyTorch-style uniform(+-1/sqrt(fan_in)) init; weights stored as (in, out)."""
    ks = jax.random.split(key, 8)

    def lin(kw, kb, fan_in, fan_out):
        bound = 1.0 / jnp.sqrt(jnp.float32(fan_in))
        w = jax.random.uniform(kw, (fan_in, fan_out), jnp.float32, -bound, bound)
        b = jax.random.uniform(kb, (1, fan_out), jnp.float32, -bound, bound)
        return w, b

    w1, b1 = lin(ks[0], ks[1], state_size, hidden)
    w2, b2 = lin(ks[2], ks[3], hidden, hidden)
    wa, ba = lin(ks[4], ks[5], hidden, action_size)
    wv, bv = lin(ks[6], ks[7], hidden, 1)
    return dict(w1=w1, b1=b1, w2=w2, b2=b2, wa=wa, ba=ba, wv=wv, bv=bv)


if __name__ == "__main__":
    key = jax.random.PRNGKey(0)
    k_params, k_x = jax.random.split(key)

    batch = 2
    state_size = 32
    action_size = 8

    params = init_params(k_params, state_size, action_size)
    x = jax.random.normal(k_x, (batch, state_size), jnp.float32)

    ref_probs, ref_value = policy_network_reference(x, params)

    # One-time param prep (head fusion, lane padding, bf16 weight cast), then run.
    prepared, A = prepare_params(params, mxu_dtype=jnp.bfloat16)
    probs, value = policy_network_forward(x, prepared, A)
    jax.block_until_ready((probs, value))

    assert probs.shape == (batch, action_size)
    assert value.shape == (batch,)
    assert jnp.allclose(jnp.sum(probs, axis=-1), 1.0, atol=1e-3)
    assert jnp.allclose(probs, ref_probs, atol=5e-2)
    assert jnp.allclose(value, ref_value, atol=5e-2)

    # f32-fed MXU path (same kernel, different prepared weight dtype).
    prepared32, _ = prepare_params(params, mxu_dtype=jnp.float32)
    probs32, value32 = policy_network_forward(x, prepared32, A)
    jax.block_until_ready((probs32, value32))
    assert jnp.allclose(probs32, ref_probs, atol=5e-3)
    assert jnp.allclose(value32, ref_value, atol=5e-3)

    print("KERNEL_OK")
</pallas_src>

<mosaic_0001>
module attributes {stable_mosaic.version = 11 : i64} {
  func.func @_policy_kernel(%arg0: i32, %arg1: memref<8x32xf32, #tpu.memory_space<vmem>>, %arg2: memref<32x128xbf16, #tpu.memory_space<vmem>>, %arg3: memref<1x128xf32, #tpu.memory_space<vmem>>, %arg4: memref<128x128xbf16, #tpu.memory_space<vmem>>, %arg5: memref<1x128xf32, #tpu.memory_space<vmem>>, %arg6: memref<128x128xbf16, #tpu.memory_space<vmem>>, %arg7: memref<1x128xf32, #tpu.memory_space<vmem>>, %arg8: memref<8x9xf32, #tpu.memory_space<vmem>>) attributes {dimension_semantics = [#tpu.dimension_semantics<parallel>], iteration_bounds = array<i64: 1>, scalar_prefetch = 0 : i64, scratch_operands = 0 : i64, tpu.core_type = #tpu.core_type<tc>, window_params = [{transform_indices = @transform_0, window_bounds = array<i64: 8, 32>}, {pipeline_mode = #tpu.pipeline_mode<synchronous>, transform_indices = @transform_1, window_bounds = array<i64: 32, 128>}, {pipeline_mode = #tpu.pipeline_mode<synchronous>, transform_indices = @transform_2, window_bounds = array<i64: 1, 128>}, {pipeline_mode = #tpu.pipeline_mode<synchronous>, transform_indices = @transform_3, window_bounds = array<i64: 128, 128>}, {pipeline_mode = #tpu.pipeline_mode<synchronous>, transform_indices = @transform_4, window_bounds = array<i64: 1, 128>}, {pipeline_mode = #tpu.pipeline_mode<synchronous>, transform_indices = @transform_5, window_bounds = array<i64: 128, 128>}, {pipeline_mode = #tpu.pipeline_mode<synchronous>, transform_indices = @transform_6, window_bounds = array<i64: 1, 128>}, {transform_indices = @transform_7, window_bounds = array<i64: 8, 9>}]} {
    %c0 = arith.constant 0 : index
    %c0_0 = arith.constant 0 : index
    %0 = vector.load %arg1[%c0, %c0_0] : memref<8x32xf32, #tpu.memory_space<vmem>>, vector<8x32xf32>
    %1 = arith.truncf %0 : vector<8x32xf32> to vector<8x32xbf16>
    %c0_1 = arith.constant 0 : index
    %c0_2 = arith.constant 0 : index
    %2 = vector.load %arg2[%c0_1, %c0_2] : memref<32x128xbf16, #tpu.memory_space<vmem>>, vector<32x128xbf16>
    %cst = arith.constant dense<0.000000e+00> : vector<8x128xf32>
    %3 = tpu.matmul %1, %2, %cst {dimension_numbers = #tpu.dot_dimension_numbers<[1], [0], [0], [1], [0, 0, 1, 1], [], []>} : vector<8x32xbf16>, vector<32x128xbf16>, vector<8x128xf32> -> vector<8x128xf32>
    %c0_3 = arith.constant 0 : index
    %c0_4 = arith.constant 0 : index
    %4 = vector.load %arg3[%c0_3, %c0_4] : memref<1x128xf32, #tpu.memory_space<vmem>>, vector<1x128xf32>
    %5 = vector.broadcast %4 : vector<1x128xf32> to vector<8x128xf32>
    %6 = arith.addf %3, %5 : vector<8x128xf32>
    %cst_5 = arith.constant 0.000000e+00 : f32
    %7 = vector.broadcast %cst_5 : f32 to vector<8x128xf32>
    %8 = arith.maximumf %6, %7 : vector<8x128xf32>
    %9 = arith.truncf %8 : vector<8x128xf32> to vector<8x128xbf16>
    %c0_6 = arith.constant 0 : index
    %c0_7 = arith.constant 0 : index
    %10 = vector.load %arg4[%c0_6, %c0_7] : memref<128x128xbf16, #tpu.memory_space<vmem>>, vector<128x128xbf16>
    %cst_8 = arith.constant dense<0.000000e+00> : vector<8x128xf32>
    %11 = tpu.matmul %9, %10, %cst_8 {dimension_numbers = #tpu.dot_dimension_numbers<[1], [0], [0], [1], [0, 0, 1, 1], [], []>} : vector<8x128xbf16>, vector<128x128xbf16>, vector<8x128xf32> -> vector<8x128xf32>
    %c0_9 = arith.constant 0 : index
    %c0_10 = arith.constant 0 : index
    %12 = vector.load %arg5[%c0_9, %c0_10] : memref<1x128xf32, #tpu.memory_space<vmem>>, vector<1x128xf32>
    %13 = vector.broadcast %12 : vector<1x128xf32> to vector<8x128xf32>
    %14 = arith.addf %11, %13 : vector<8x128xf32>
    %cst_11 = arith.constant 0.000000e+00 : f32
    %15 = vector.broadcast %cst_11 : f32 to vector<8x128xf32>
    %16 = arith.maximumf %14, %15 : vector<8x128xf32>
    %17 = arith.truncf %16 : vector<8x128xf32> to vector<8x128xbf16>
    %c0_12 = arith.constant 0 : index
    %c0_13 = arith.constant 0 : index
    %18 = vector.load %arg6[%c0_12, %c0_13] : memref<128x128xbf16, #tpu.memory_space<vmem>>, vector<128x128xbf16>
    %cst_14 = arith.constant dense<0.000000e+00> : vector<8x128xf32>
    %19 = tpu.matmul %17, %18, %cst_14 {dimension_numbers = #tpu.dot_dimension_numbers<[1], [0], [0], [1], [0, 0, 1, 1], [], []>} : vector<8x128xbf16>, vector<128x128xbf16>, vector<8x128xf32> -> vector<8x128xf32>
    %c0_15 = arith.constant 0 : index
    %c0_16 = arith.constant 0 : index
    %20 = vector.load %arg7[%c0_15, %c0_16] : memref<1x128xf32, #tpu.memory_space<vmem>>, vector<1x128xf32>
    %21 = vector.broadcast %20 : vector<1x128xf32> to vector<8x128xf32>
    %22 = arith.addf %19, %21 : vector<8x128xf32>
    %23 = tpu.iota {dimensions = array<i32: 1>} : vector<1x128xi32>
    %c8_i32 = arith.constant 8 : i32
    %24 = vector.broadcast %c8_i32 : i32 to vector<1x128xi32>
    %25 = arith.cmpi eq, %23, %24 : vector<1x128xi32>
    %cst_17 = arith.constant -1.000000e+30 : f32
    %26 = vector.shape_cast %25 : vector<1x128xi1> to vector<1x128xi1>
    %27 = vector.broadcast %26 : vector<1x128xi1> to vector<8x128xi1>
    %28 = vector.broadcast %cst_17 : f32 to vector<8x128xf32>
    %29 = arith.select %27, %28, %22 : vector<8x128xi1>, vector<8x128xf32>
    %cst_18 = arith.constant dense<0xFF800000> : vector<8xf32>
    %30 = vector.multi_reduction <maximumf>, %29, %cst_18 [1] : vector<8x128xf32> to vector<8xf32>
    %31 = vector.shape_cast %30 : vector<8xf32> to vector<8x1xf32>
    %32 = vector.broadcast %31 : vector<8x1xf32> to vector<8x128xf32>
    %33 = arith.subf %29, %32 : vector<8x128xf32>
    %34 = math.exp %33 : vector<8x128xf32>
    %cst_19 = arith.constant dense<0.000000e+00> : vector<8xf32>
    %35 = vector.multi_reduction <add>, %34, %cst_19 [1] : vector<8x128xf32> to vector<8xf32>
    %36 = vector.shape_cast %35 : vector<8xf32> to vector<8x1xf32>
    %cst_20 = arith.constant 1.000000e+00 : f32
    %37 = vector.broadcast %cst_20 : f32 to vector<8x1xf32>
    %38 = arith.divf %37, %36 : vector<8x1xf32>
    %39 = vector.broadcast %38 : vector<8x1xf32> to vector<8x128xf32>
    %40 = arith.mulf %34, %39 : vector<8x128xf32>
    %41 = vector.shape_cast %25 : vector<1x128xi1> to vector<1x128xi1>
    %42 = vector.broadcast %41 : vector<1x128xi1> to vector<8x128xi1>
    %43 = arith.select %42, %22, %40 : vector<8x128xi1>, vector<8x128xf32>
    %44 = vector.extract_strided_slice %43 {offsets = [0, 0], sizes = [8, 9], strides = [1, 1]} : vector<8x128xf32> to vector<8x9xf32>
    %c0_21 = arith.constant 0 : index
    %c0_22 = arith.constant 0 : index
    %45 = vector.load %arg8[%c0_21, %c0_22] : memref<8x9xf32, #tpu.memory_space<vmem>>, vector<8x9xf32>
    tpu.vector_store %arg8[%c0_21, %c0_22], %44 {strides = array<i32>} : memref<8x9xf32, #tpu.memory_space<vmem>>, vector<8x9xf32>,
    return
  }
  func.func @transform_0(%arg0: i32) -> (i32, i32) {
    %c0_i32 = arith.constant 0 : i32
    %c0_i32_0 = arith.constant 0 : i32
    return %arg0, %c0_i32 : i32, i32
  }
  func.func @transform_1(%arg0: i32) -> (i32, i32) {
    %c0_i32 = arith.constant 0 : i32
    %c0_i32_0 = arith.constant 0 : i32
    %c0_i32_1 = arith.constant 0 : i32
    return %c0_i32, %c0_i32_0 : i32, i32
  }
  func.func @transform_2(%arg0: i32) -> (i32, i32) {
    %c0_i32 = arith.constant 0 : i32
    %c0_i32_0 = arith.constant 0 : i32
    %c0_i32_1 = arith.constant 0 : i32
    return %c0_i32, %c0_i32_0 : i32, i32
  }
  func.func @transform_3(%arg0: i32) -> (i32, i32) {
    %c0_i32 = arith.constant 0 : i32
    %c0_i32_0 = arith.constant 0 : i32
    %c0_i32_1 = arith.constant 0 : i32
    return %c0_i32, %c0_i32_0 : i32, i32
  }
  func.func @transform_4(%arg0: i32) -> (i32, i32) {
    %c0_i32 = arith.constant 0 : i32
    %c0_i32_0 = arith.constant 0 : i32
    %c0_i32_1 = arith.constant 0 : i32
    return %c0_i32, %c0_i32_0 : i32, i32
  }
  func.func @transform_5(%arg0: i32) -> (i32, i32) {
    %c0_i32 = arith.constant 0 : i32
    %c0_i32_0 = arith.constant 0 : i32
    %c0_i32_1 = arith.constant 0 : i32
    return %c0_i32, %c0_i32_0 : i32, i32
  }
  func.func @transform_6(%arg0: i32) -> (i32, i32) {
    %c0_i32 = arith.constant 0 : i32
    %c0_i32_0 = arith.constant 0 : i32
    %c0_i32_1 = arith.constant 0 : i32
    return %c0_i32, %c0_i32_0 : i32, i32
  }
  func.func @transform_7(%arg0: i32) -> (i32, i32) {
    %c0_i32 = arith.constant 0 : i32
    %c0_i32_0 = arith.constant 0 : i32
    return %arg0, %c0_i32 : i32, i32
  }
}

</mosaic_0001>

<bundles_post_ra>
// kernel: tpu_custom_call.1
= control target key start
LH: loop header
LB: loop body
LE: loop exit
PB: predicated region body
PF: predicated region fallthrough
CT: control target
= control target key end

     0   :  { %12 = vsyncpa [#allocation3], 0  ;;  %s805_s0 = inlined_call_operand.hbm [shape: f32[8,32], index: 0, kind: input, shape index: {}]   ;;  %s806_s1 = inlined_call_operand.hbm [shape: bf16[32,128], index: 1, kind: input, shape index: {}]   ;;  %s807_s2 = inlined_call_operand.vmem [shape: f32[1,128], index: 2, kind: input, shape index: {}]   ;;  %s808_s3 = inlined_call_operand.hbm [shape: bf16[128,128], index: 3, kind: input, shape index: {}]   ;;  %s809_s4 = inlined_call_operand.vmem [shape: f32[1,128], index: 4, kind: input, shape index: {}]   ;;  %s810_s5 = inlined_call_operand.hbm [shape: bf16[128,128], index: 5, kind: input, shape index: {}]   ;;  %s811_s6 = inlined_call_operand.vmem [shape: f32[1,128], index: 6, kind: input, shape index: {}]   ;;  %s812_s7 = inlined_call_operand.hbm [shape: f32[8,9], index: 7, kind: output, shape index: {}]  }
   0x1   :  { %13 = vsyncpa [#allocation6], 0 }
   0x2   :  { %14 = vsyncpa [#allocation9], 0 }
   0x3   :  { %15 = vsyncpa [#allocation4], 0  ;;  %s652_s24 = smov [#allocation5]   ;;  %s534_s28 = scalar_lea.hbm %s806_s1, 256 }
   0x4   :  { %s31_s25 = sshll.u32 %s652_s24, 4  ;;  %p535_p0 = scmp.ne.s32.totalorder %s806_s1, %s534_s28  ;;  %s32_s25 = int_to_ptr.vmem [resolvable:$true] %s31_s25 }
   0x5   :  { %p538_p1 = scmp.lt.u32.totalorder %s534_s28, %s806_s1 }
   0x7   :  { %p540_p2 = pnand %p538_p1, %p535_p0 }
   0x9   :  { %543 = shalt.err (!%p540_p2)
}
   0xa   :  { %s544_s10 = scalar_lea.vmem %s32_s25, 256  ;;  %p549_p4 = scmp.lt.s32.totalorder %s32_s25, %s32_s25 }
   0xb   :  { %p545_p3 = scmp.ne.s32.totalorder %s32_s25, %s544_s10  ;;  %p550_p5 = scmp.lt.s32.totalorder %s544_s10, %s544_s10 }
   0xd   :  { %p551_p6 = por %p550_p5, %p549_p4 }
   0xf   :  { %p552_p7 = pnand %p551_p6, %p545_p3 }
  0x11   :  { %555 = shalt.err (!%p552_p7)
}
  0x12   :  { %s653_s11 = smov 64   ;;  %s654_s12 = smov 4  }
  0x13   :  { %37 = dma.hbm_to_vmem [thread:$0]  %s806_s1, 256, %s32_s25, [#allocation6], %s653_s11, %s653_s11, %s654_s12  }
  0x14   :  { %s655_s15 = smov [#allocation2]   ;;  %s656_s17 = smov [#allocation7]  }
  0x15   :  { %s22_s16 = sshll.u32 %s655_s15, 4  ;;  %s45_s18 = sshll.u32 %s656_s17, 4  ;;  %s23_s16 = int_to_ptr.vmem [resolvable:$true] %s22_s16  ;;  %s46_s18 = int_to_ptr.vmem [resolvable:$true] %s45_s18 }
  0x16   :  { %s556_s21 = scalar_lea.hbm %s805_s0, 128 }
  0x17   :  { %p557_p8 = scmp.ne.s32.totalorder %s805_s0, %s556_s21  ;;  %p560_p9 = scmp.lt.u32.totalorder %s556_s21, %s805_s0 }
  0x19   :  { %p562_p10 = pnand %p560_p9, %p557_p8 }
  0x1b   :  { %565 = shalt.err (!%p562_p10)
}
  0x1c   :  { %s566_s1 = scalar_lea.vmem %s23_s16, 128  ;;  %p571_p12 = scmp.lt.s32.totalorder %s23_s16, %s23_s16 }
  0x1d   :  { %p567_p11 = scmp.ne.s32.totalorder %s23_s16, %s566_s1  ;;  %p572_p13 = scmp.lt.s32.totalorder %s566_s1, %s566_s1 }
  0x1f   :  { %p573_p0 = por %p572_p13, %p571_p12 }
  0x21   :  { %p574_p1 = pnand %p573_p0, %p567_p11 }
  0x23   :  { %577 = shalt.err (!%p574_p1)
}
  0x24   :  { %25 = dma.hbm_to_vmem [thread:$0]  %s805_s0, 128, %s23_s16, [#allocation3]  }
  0x25   :  { %s578_s30 = scalar_lea.hbm %s808_s3, 1024 }
  0x26   :  { %p579_p2 = scmp.ne.s32.totalorder %s808_s3, %s578_s30  ;;  %p582_p3 = scmp.lt.u32.totalorder %s578_s30, %s808_s3 }
  0x28   :  { %p584_p4 = pnand %p582_p3, %p579_p2 }
  0x2a   :  { %587 = shalt.err (!%p584_p4)
}
  0x2b   :  { %s588_s14 = scalar_lea.vmem %s46_s18, 1024  ;;  %p593_p6 = scmp.lt.s32.totalorder %s46_s18, %s46_s18 }
  0x2c   :  { %p589_p5 = scmp.ne.s32.totalorder %s46_s18, %s588_s14  ;;  %p594_p7 = scmp.lt.s32.totalorder %s588_s14, %s588_s14 }
  0x2e   :  { %p595_p8 = por %p594_p7, %p593_p6 }
  0x30   :  { %p596_p9 = pnand %p595_p8, %p589_p5 }
  0x32   :  { %599 = shalt.err (!%p596_p9)
}
  0x33   :  { %51 = dma.hbm_to_vmem [thread:$0]  %s808_s3, 1024, %s46_s18, [#allocation6], %s653_s11, %s653_s11, %s654_s12  }
  0x34   :  { %s657_s16 = smov [#allocation8]   ;;  %s600_s21 = scalar_lea.hbm %s810_s5, 1024 }
  0x35   :  { %s59_s17 = sshll.u32 %s657_s16, 4  ;;  %p601_p10 = scmp.ne.s32.totalorder %s810_s5, %s600_s21  ;;  %s60_s17 = int_to_ptr.vmem [resolvable:$true] %s59_s17 }
  0x36   :  { %p604_p11 = scmp.lt.u32.totalorder %s600_s21, %s810_s5 }
  0x38   :  { %p606_p12 = pnand %p604_p11, %p601_p10 }
  0x3a   :  { %609 = shalt.err (!%p606_p12)
}
  0x3b   :  { %s610_s1 = scalar_lea.vmem %s60_s17, 1024  ;;  %p615_p0 = scmp.lt.s32.totalorder %s60_s17, %s60_s17 }
  0x3c   :  { %p611_p13 = scmp.ne.s32.totalorder %s60_s17, %s610_s1  ;;  %p616_p1 = scmp.lt.s32.totalorder %s610_s1, %s610_s1 }
  0x3e   :  { %p617_p2 = por %p616_p1, %p615_p0 }
  0x40   :  { %p618_p3 = pnand %p617_p2, %p611_p13 }
  0x42   :  { %621 = shalt.err (!%p618_p3)
}
  0x43   :  { %65 = dma.hbm_to_vmem [thread:$0]  %s810_s5, 1024, %s60_s17, [#allocation9], %s653_s11, %s653_s11, %s654_s12  }
  0x44   :  { %644 = dma.done.wait [#allocation3], 128  }
  0x45   :  { %645 = vsyncadd [#allocation3], 4294967168 }
  0x46   :  { %646 = dma.done.wait [#allocation6], 1280  }
  0x47   :  { %647 = vsyncadd [#allocation6], 4294966016 }
  0x48   :  { %648 = dma.done.wait [#allocation9], 1024  }
  0x49   :  { %649 = vsyncadd [#allocation9], 4294966272  ;;  %v658_v0 = vmov 0.0   ;;  %vm659_vm0 = vmmov 0   ;;  %v512_v1 = vld [vmem:[#allocation5] sm:$0xff]   ;;  %v513_v2 = vld [vmem:[#allocation5 + $0x8] sm:$0xff]   ;;  %v376_v37 = vlaneseq }
  0x4a   :  { %455 = vmatprep.subr.bf16.mxu0 %v658_v0  ;;  %459 = vmatprep.mubr.msk.bf16.mxu0 %vm659_vm0, %v658_v0  ;;  %v81_v3 = vld [vmem:[#allocation2] sm:$0xff]  ;;  %v514_v4 = vld [vmem:[#allocation7] sm:$0xff]   ;;  %vm106_vm1 = vcmask 261120   ;;  %v516_v7 = vld [vmem:[#allocation7 + $0x10] sm:$0xff]   ;;  %vm393_vm3 = vcmask 72704  }
  0x4b   :  { %463 = vmatprep.subr.bf16.mxu1 %v658_v0  ;;  %479 = vmatprep.mubr.msk.bf16.mxu1 %vm659_vm0, %v658_v0  ;;  %v82_v5 = vpack.c.bf16 %v81_v3, %v81_v3  ;;  %v515_v6 = vld [vmem:[#allocation7 + $0x8] sm:$0xff]   ;;  %v517_v8 = vld [vmem:[#allocation7 + $0x18] sm:$0xff]   ;;  %v518_v9 = vld [vmem:[#allocation7 + $0x20] sm:$0xff]   ;;  %v377_v38 = vand.u32 127, %v376_v37 }
  0x4c   :  { %456 = vmatpush3.bf16.msra.mxu0 %v512_v1  ;;  %464 = vmatpush3.bf16.msra.mxu1 %v514_v4  ;;  %v519_v10 = vld [vmem:[#allocation7 + $0x28] sm:$0xff]   ;;  %v520_v11 = vld [vmem:[#allocation7 + $0x30] sm:$0xff]   ;;  %v521_v12 = vld [vmem:[#allocation7 + $0x38] sm:$0xff]  }
  0x4d   :  { %457 = vmatprep.subr.bf16.mxu0 %v658_v0  ;;  %465 = vmatprep.subr.bf16.mxu1 %v658_v0  ;;  %v522_v13 = vld [vmem:[#allocation8] sm:$0xff]   ;;  %v523_v14 = vld [vmem:[#allocation8 + $0x8] sm:$0xff]   ;;  %v524_v15 = vld [vmem:[#allocation8 + $0x10] sm:$0xff]   ;;  %vm378_vm2 = vcmp.eq.s32.totalorder %v377_v38, 8 }
  0x4e   :  { %v525_v16 = vld [vmem:[#allocation8 + $0x18] sm:$0xff]   ;;  %v526_v17 = vld [vmem:[#allocation8 + $0x20] sm:$0xff]   ;;  %v527_v18 = vld [vmem:[#allocation8 + $0x28] sm:$0xff]  }
  0x4f   :  { %v412_v19 = vld [vmem:[%s807_s2] ss:$0 sm:$0xff]  ;;  %v528_v27 = vld [vmem:[#allocation8 + $0x30] sm:$0xff]   ;;  %v529_v28 = vld [vmem:[#allocation8 + $0x38] sm:$0xff]  }
  0x50   :  { %458 = vmatpush3.bf16.msra.mxu0 %v513_v2  ;;  %466 = vmatpush3.bf16.msra.mxu1 %v515_v6  ;;  %v416_v29 = vld [vmem:[%s809_s4] ss:$0 sm:$0xff]  ;;  %s660_s4 = smov [#allocation10]  }
  0x51   :  { %483 = vmatprep.subr.bf16.mxu0 %v658_v0  ;;  %467 = vmatprep.subr.bf16.mxu1 %v658_v0  ;;  %v425_v39 = vld [vmem:[%s811_s6] ss:$0 sm:$0xff]  ;;  %s401_s28 = sshll.u32 %s660_s4, 4  ;;  %s402_s28 = int_to_ptr.vmem [resolvable:$true] %s401_s28 }
  0x52   :  { %s622_s6 = scalar_lea.vmem %s402_s28, 128  ;;  %p627_p5 = scmp.lt.s32.totalorder %s402_s28, %s402_s28 }
  0x53   :  { %460 = vmatmul.mubr.msk.bf16.vlgmr.msra.gmra.mrb[0].mxu0 %vm106_vm1, %v82_v5  ;;  %p623_p4 = scmp.ne.s32.totalorder %s402_s28, %s622_s6  ;;  %p628_p6 = scmp.lt.s32.totalorder %s622_s6, %s622_s6 }
  0x54   :  { %499 = vmatprep.mubr.msk.bf16.mxu0 %vm659_vm0, %v658_v0  ;;  %468 = vmatpush3.bf16.msra.mxu1 %v516_v7 }
  0x55   :  { %469 = vmatprep.subr.bf16.mxu1 %v658_v0  ;;  %484 = vmatpush3.bf16.msra.mxu0 %v522_v13  ;;  %p629_p7 = por %p628_p6, %p627_p5 }
  0x56   :  { %485 = vmatprep.subr.bf16.mxu0 %v658_v0 }
  0x57   :  { %p630_p8 = pnand %p629_p7, %p623_p4 }
  0x58   :  { %470 = vmatpush3.bf16.msra.mxu1 %v517_v8 }
  0x59   :  { %471 = vmatprep.subr.bf16.mxu1 %v658_v0  ;;  %486 = vmatpush3.bf16.msra.mxu0 %v523_v14 }
  0x5a   :  { %487 = vmatprep.subr.bf16.mxu0 %v658_v0 }
  0x5c   :  { %472 = vmatpush3.bf16.msra.mxu1 %v518_v9 }
  0x5d   :  { %473 = vmatprep.subr.bf16.mxu1 %v658_v0  ;;  %488 = vmatpush3.bf16.msra.mxu0 %v524_v15 }
  0x5e   :  { %489 = vmatprep.subr.bf16.mxu0 %v658_v0 }
  0x60   :  { %474 = vmatpush3.bf16.msra.mxu1 %v519_v10 }
  0x61   :  { %475 = vmatprep.subr.bf16.mxu1 %v658_v0  ;;  %490 = vmatpush3.bf16.msra.mxu0 %v525_v16 }
  0x62   :  { %491 = vmatprep.subr.bf16.mxu0 %v658_v0 }
  0x64   :  { %476 = vmatpush3.bf16.msra.mxu1 %v520_v11 }
  0x65   :  { %477 = vmatprep.subr.bf16.mxu1 %v658_v0  ;;  %492 = vmatpush3.bf16.msra.mxu0 %v526_v17 }
  0x66   :  { %493 = vmatprep.subr.bf16.mxu0 %v658_v0 }
  0x68   :  { %478 = vmatpush3.bf16.msra.mxu1 %v521_v12 }
  0x69   :  { %494 = vmatpush3.bf16.msra.mxu0 %v527_v18 }
  0x6a   :  { %495 = vmatprep.subr.bf16.mxu0 %v658_v0 }
  0x6d   :  { %496 = vmatpush3.bf16.msra.mxu0 %v528_v27 }
  0x6e   :  { %497 = vmatprep.subr.bf16.mxu0 %v658_v0 }
  0x71   :  { %498 = vmatpush3.bf16.msra.mxu0 %v529_v28 }
 0x126   :  { %v144_v20 = vpop.f32.mrb[0].mxu0 }
 0x127   :  { %v145_v21 = vadd.f32 %v412_v19, %v144_v20  ;;  %v461_v22 = vpop.f32.mrb[1].mxu0 }
 0x128   :  { %v147_v23 = vpop.f32.mrb[2].mxu0 }
 0x129   :  { %v150_v24 = vmax.f32 %v145_v21, 0.0  ;;  %v462_v25 = vpop.f32.mrb[3].mxu0 }
 0x12b   :  { %v151_v26 = vpack.c.bf16 %v150_v24, %v150_v24 }
 0x12d   :  { %480 = vmatmul.mubr.bf16.vlgmr.msra.gmra.mrb[0].mxu1 %v151_v26 }
 0x200   :  { %v257_v30 = vpop.f32.mrb[0].mxu1 }
 0x201   :  { %v258_v31 = vadd.f32 %v416_v29, %v257_v30  ;;  %v481_v32 = vpop.f32.mrb[1].mxu1 }
 0x202   :  { %v260_v33 = vpop.f32.mrb[2].mxu1 }
 0x203   :  { %v263_v34 = vmax.f32 %v258_v31, 0.0  ;;  %v482_v35 = vpop.f32.mrb[3].mxu1 }
 0x205   :  { %v264_v36 = vpack.c.bf16 %v263_v34, %v263_v34 }
 0x207   :  { %500 = vmatmul.mubr.bf16.vlgmr.msra.gmra.mrb[4].mxu0 %v264_v36 }
 0x2da   :  { %v370_v40 = vpop.f32.mrb[4].mxu0 }
 0x2db   :  { %v371_v41 = vadd.f32 %v425_v39, %v370_v40  ;;  %v501_v42 = vpop.f32.mrb[5].mxu0 }
 0x2dc   :  { %v373_v43 = vpop.f32.mrb[6].mxu0 }
 0x2dd   :  { %v502_v44 = vpop.f32.mrb[7].mxu0  ;;  %v381_v45 = vsel %vm378_vm2, -1e+30, %v371_v41 }
 0x2de   :  { %382 = vmax.xlane.f32.xlu0 %v381_v45 }
 0x36b   :  { %v383_v46 = vpop.xlane.xlu0 %382 }
 0x36c   :  { %v384_v47 = vsub.f32 %v381_v45, %v383_v46 }
 0x36e   :  { %v385_v48 = vmul.f32 1.442695, %v384_v47 }
 0x370   :  { %530 = vpow2.f32 %v385_v48 }
 0x37a   :  { %v531_v49 = vpop.eup %530 }
 0x37b   :  { %387 = vadd.xlane.f32.xlu0 %v531_v49 }
 0x408   :  { %v388_v50 = vpop.xlane.xlu0 %387 }
 0x409   :  { %532 = vrcp.f32 %v388_v50 }
 0x413   :  { %v533_v51 = vpop.eup %532 }
 0x414   :  { %v391_v52 = vmul.f32 %v533_v51, %v531_v49 }
 0x416   :  { %v392_v53 = vsel %vm378_vm2, %v371_v41, %v391_v52 }
 0x417   :  { %394 = vst.msk [vmem:[#allocation10] sm:$0xff] %vm393_vm3, %v392_v53 }
 0x418   :  { %633 = shalt.err (!%p630_p8)
}
 0x419   :  { %s634_s8 = scalar_lea.hbm %s812_s7, 128 }
 0x41a   :  { %p635_p9 = scmp.ne.s32.totalorder %s812_s7, %s634_s8  ;;  %p638_p10 = scmp.lt.u32.totalorder %s634_s8, %s812_s7 }
 0x41c   :  { %p640_p11 = pnand %p638_p10, %p635_p9 }
 0x41e   :  { %643 = shalt.err (!%p640_p11)
}
 0x41f   :  { %404 = dma.vmem_to_hbm [thread:$0]  %s402_s28, 128, %s812_s7, [#allocation4]  }
 0x420   :  { %650 = dma.done.wait [#allocation4], 128  }
 0x421   :  { %651 = vsyncadd [#allocation4], 4294967168 }
 0x422   :  { %408 = vsyncpa [#allocation3], 1 }
 0x423   :  { %409 = vsyncpa [#allocation6], 1 }
 0x424   :  { %410 = vsyncpa [#allocation9], 1 }
 0x425   :  { %411 = vsyncpa [#allocation4], 1 }

</bundles_post_ra>
